<compile_context>
chip_gen: v6e
topology: v6e:2x2x1
jax: 0.10.0
libtpu: 0.0.40
codegen_flags: <defaults>
</compile_context>

<pallas_src>
import jax
import jax.numpy as jnp
from jax.experimental import pallas as pl
from jax.experimental.pallas import tpu as pltpu


def _dtr_kernel(x_ref, w1_ref, b1_ref, w2_ref, b2_ref, o_ref):
    """Single-invocation fused forward.

    x_ref : (B, M*H)            flattened input (measurement-blocked columns)
    w1_ref: (M*H, M*hid1)       block-diagonal layer-1 weights
    b1_ref: (1, M*hid1)         flattened layer-1 bias (f32)
    w2_ref: (M*hid1, M*hid2)    block-diagonal layer-2 weights
    b2_ref: (1, M*hid2)         flattened layer-2 bias (f32)
    o_ref : (B, M*hid2)         output == linear_layers(X).flatten(1)
    """
    h = jnp.dot(x_ref[...], w1_ref[...],
                preferred_element_type=jnp.float32) + b1_ref[...]

    # TODO(synk): nn.Dropout(p=0.01) between the two TLinear layers is the identity
    # at inference (eval mode); training-mode masking/rescale is not implemented.

    y = jnp.dot(h.astype(w2_ref.dtype), w2_ref[...],
                preferred_element_type=jnp.float32) + b2_ref[...]
    o_ref[...] = y.astype(o_ref.dtype)


def _block_diag(w):
    """(M, din, dout) -> block-diagonal (M*din, M*dout), diagonal block m = w[m]."""
    M, din, dout = w.shape
    eye = jnp.eye(M, dtype=w.dtype)
    return jnp.einsum("mio,mn->mino", w, eye).reshape(M * din, M * dout)


def dtr_forward(X, w1, b1, w2, b2, *, compute_dtype=jnp.float32):
    """Pallas forward of DTRModel.

    X : (batch, M, H_dim)              -- PyTorch convention
    w1: (M, H_dim, hid1), b1: (M, hid1)
    w2: (M, hid1,  hid2), b2: (M, hid2)
    returns f: (batch, M * hid2) == linear_layers(X).flatten(1)
    """
    B, M, H = X.shape
    hid1 = w1.shape[-1]
    hid2 = w2.shape[-1]

    # Contiguous, transpose-free packing: (B, M, H) -> (B, M*H).
    x2d = X.reshape(B, M * H).astype(compute_dtype)

    # Block-diagonal fused weights (in production these are weight-only and should
    # be precomputed/cached outside the per-call path).
    w1bd = _block_diag(w1).astype(compute_dtype)            # (M*H,    M*hid1)
    w2bd = _block_diag(w2).astype(compute_dtype)            # (M*hid1, M*hid2)
    b1f = b1.reshape(1, M * hid1).astype(jnp.float32)       # biases stay f32 (VPU add)
    b2f = b2.reshape(1, M * hid2).astype(jnp.float32)

    out = pl.pallas_call(
        _dtr_kernel,
        out_shape=jax.ShapeDtypeStruct((B, M * hid2), jnp.float32),
        grid=(1,),
        in_specs=[
            pl.BlockSpec((B, M * H), lambda i: (0, 0)),
            pl.BlockSpec((M * H, M * hid1), lambda i: (0, 0)),
            pl.BlockSpec((1, M * hid1), lambda i: (0, 0)),
            pl.BlockSpec((M * hid1, M * hid2), lambda i: (0, 0)),
            pl.BlockSpec((1, M * hid2), lambda i: (0, 0)),
        ],
        out_specs=pl.BlockSpec((B, M * hid2), lambda i: (0, 0)),
        compiler_params=pltpu.CompilerParams(
            dimension_semantics=("arbitrary",),   # single step; no cross-TC split
        ),
    )(x2d, w1bd, b1f, w2bd, b2f)

    # `out` is already (B, M*hid2) == flatten(1); no transpose/reshape needed.
    return out


def _reference_forward(X, w1, b1, w2, b2):
    """Pure-JAX reference mirroring TLinear chaining + flatten(1)."""
    h = jnp.einsum("bmi,mio->bmo", X, w1) + b1[None]
    y = jnp.einsum("bmi,mio->bmo", h, w2) + b2[None]
    return y.reshape(y.shape[0], -1)


if __name__ == "__main__":
    # Small shapes consistent with the module.
    batch = 8
    num_measurements = 4        # utils.num_measurements
    H_dim = 32
    hidden_dim = (32, 16)

    key = jax.random.PRNGKey(0)
    kx, k1, k2, k3, k4 = jax.random.split(key, 5)

    X = jax.random.normal(kx, (batch, num_measurements, H_dim), dtype=jnp.float32)
    # torch.rand -> uniform [0, 1)
    w1 = jax.random.uniform(k1, (num_measurements, H_dim, hidden_dim[0]), dtype=jnp.float32)
    b1 = jax.random.uniform(k2, (num_measurements, hidden_dim[0]), dtype=jnp.float32)
    w2 = jax.random.uniform(k3, (num_measurements, hidden_dim[0], hidden_dim[1]), dtype=jnp.float32)
    b2 = jax.random.uniform(k4, (num_measurements, hidden_dim[1]), dtype=jnp.float32)

    f_ref = _reference_forward(X, w1, b1, w2, b2)

    # f32 operands: exact parity with the PyTorch module.
    f = jax.block_until_ready(dtr_forward(X, w1, b1, w2, b2))
    assert f.shape == (batch, num_measurements * hidden_dim[-1]), f.shape
    assert jnp.allclose(f, f_ref, atol=1e-4, rtol=1e-4), "f32 kernel mismatch vs reference"

    # bf16 operands + f32 MXU accumulation (v6e/v7x fast path): looser tolerance.
    f_bf16 = jax.block_until_ready(
        dtr_forward(X, w1, b1, w2, b2, compute_dtype=jnp.bfloat16))
    assert jnp.allclose(f_bf16, f_ref, atol=0.5, rtol=5e-2), "bf16 kernel mismatch vs reference"

    print("KERNEL_OK")
</pallas_src>

<mosaic_0001>
module attributes {stable_mosaic.version = 11 : i64} {
  func.func @_dtr_kernel(%arg0: i32, %arg1: memref<8x128xf32, #tpu.memory_space<vmem>>, %arg2: memref<128x128xf32, #tpu.memory_space<vmem>>, %arg3: memref<1x128xf32, #tpu.memory_space<vmem>>, %arg4: memref<128x64xf32, #tpu.memory_space<vmem>>, %arg5: memref<1x64xf32, #tpu.memory_space<vmem>>, %arg6: memref<8x64xf32, #tpu.memory_space<vmem>>) attributes {dimension_semantics = [#tpu.dimension_semantics<arbitrary>], iteration_bounds = array<i64: 1>, scalar_prefetch = 0 : i64, scratch_operands = 0 : i64, tpu.core_type = #tpu.core_type<tc>, window_params = [{pipeline_mode = #tpu.pipeline_mode<synchronous>, transform_indices = @transform_0, window_bounds = array<i64: 8, 128>}, {pipeline_mode = #tpu.pipeline_mode<synchronous>, transform_indices = @transform_1, window_bounds = array<i64: 128, 128>}, {pipeline_mode = #tpu.pipeline_mode<synchronous>, transform_indices = @transform_2, window_bounds = array<i64: 1, 128>}, {pipeline_mode = #tpu.pipeline_mode<synchronous>, transform_indices = @transform_3, window_bounds = array<i64: 128, 64>}, {pipeline_mode = #tpu.pipeline_mode<synchronous>, transform_indices = @transform_4, window_bounds = array<i64: 1, 64>}, {pipeline_mode = #tpu.pipeline_mode<synchronous>, transform_indices = @transform_5, window_bounds = array<i64: 8, 64>}]} {
    %c0 = arith.constant 0 : index
    %c0_0 = arith.constant 0 : index
    %0 = vector.load %arg1[%c0, %c0_0] : memref<8x128xf32, #tpu.memory_space<vmem>>, vector<8x128xf32>
    %c0_1 = arith.constant 0 : index
    %c0_2 = arith.constant 0 : index
    %1 = vector.load %arg2[%c0_1, %c0_2] : memref<128x128xf32, #tpu.memory_space<vmem>>, vector<128x128xf32>
    %cst = arith.constant dense<0.000000e+00> : vector<8x128xf32>
    %2 = tpu.matmul %0, %1, %cst {dimension_numbers = #tpu.dot_dimension_numbers<[1], [0], [0], [1], [0, 0, 1, 1], [], []>} : vector<8x128xf32>, vector<128x128xf32>, vector<8x128xf32> -> vector<8x128xf32>
    %c0_3 = arith.constant 0 : index
    %c0_4 = arith.constant 0 : index
    %3 = vector.load %arg3[%c0_3, %c0_4] : memref<1x128xf32, #tpu.memory_space<vmem>>, vector<1x128xf32>
    %4 = vector.broadcast %3 : vector<1x128xf32> to vector<8x128xf32>
    %5 = arith.addf %2, %4 : vector<8x128xf32>
    %c0_5 = arith.constant 0 : index
    %c0_6 = arith.constant 0 : index
    %6 = vector.load %arg4[%c0_5, %c0_6] : memref<128x64xf32, #tpu.memory_space<vmem>>, vector<128x64xf32>
    %cst_7 = arith.constant dense<0.000000e+00> : vector<8x64xf32>
    %7 = tpu.matmul %5, %6, %cst_7 {dimension_numbers = #tpu.dot_dimension_numbers<[1], [0], [0], [1], [0, 0, 1, 1], [], []>} : vector<8x128xf32>, vector<128x64xf32>, vector<8x64xf32> -> vector<8x64xf32>
    %c0_8 = arith.constant 0 : index
    %c0_9 = arith.constant 0 : index
    %8 = vector.load %arg5[%c0_8, %c0_9] : memref<1x64xf32, #tpu.memory_space<vmem>>, vector<1x64xf32>
    %9 = vector.broadcast %8 : vector<1x64xf32> to vector<8x64xf32>
    %10 = arith.addf %7, %9 : vector<8x64xf32>
    %c0_10 = arith.constant 0 : index
    %c0_11 = arith.constant 0 : index
    %11 = vector.load %arg6[%c0_10, %c0_11] : memref<8x64xf32, #tpu.memory_space<vmem>>, vector<8x64xf32>
    tpu.vector_store %arg6[%c0_10, %c0_11], %10 {strides = array<i32>} : memref<8x64xf32, #tpu.memory_space<vmem>>, vector<8x64xf32>,
    return
  }
  func.func @transform_0(%arg0: i32) -> (i32, i32) {
    %c0_i32 = arith.constant 0 : i32
    %c0_i32_0 = arith.constant 0 : i32
    %c0_i32_1 = arith.constant 0 : i32
    return %c0_i32, %c0_i32_0 : i32, i32
  }
  func.func @transform_1(%arg0: i32) -> (i32, i32) {
    %c0_i32 = arith.constant 0 : i32
    %c0_i32_0 = arith.constant 0 : i32
    %c0_i32_1 = arith.constant 0 : i32
    return %c0_i32, %c0_i32_0 : i32, i32
  }
  func.func @transform_2(%arg0: i32) -> (i32, i32) {
    %c0_i32 = arith.constant 0 : i32
    %c0_i32_0 = arith.constant 0 : i32
    %c0_i32_1 = arith.constant 0 : i32
    return %c0_i32, %c0_i32_0 : i32, i32
  }
  func.func @transform_3(%arg0: i32) -> (i32, i32) {
    %c0_i32 = arith.constant 0 : i32
    %c0_i32_0 = arith.constant 0 : i32
    %c0_i32_1 = arith.constant 0 : i32
    return %c0_i32, %c0_i32_0 : i32, i32
  }
  func.func @transform_4(%arg0: i32) -> (i32, i32) {
    %c0_i32 = arith.constant 0 : i32
    %c0_i32_0 = arith.constant 0 : i32
    %c0_i32_1 = arith.constant 0 : i32
    return %c0_i32, %c0_i32_0 : i32, i32
  }
  func.func @transform_5(%arg0: i32) -> (i32, i32) {
    %c0_i32 = arith.constant 0 : i32
    %c0_i32_0 = arith.constant 0 : i32
    %c0_i32_1 = arith.constant 0 : i32
    return %c0_i32, %c0_i32_0 : i32, i32
  }
}

</mosaic_0001>

<bundles_post_ra>
// kernel: tpu_custom_call.1
= control target key start
LH: loop header
LB: loop body
LE: loop exit
PB: predicated region body
PF: predicated region fallthrough
CT: control target
= control target key end

     0   :  { %v355_v1 = vmov 0.0   ;;  %vm356_vm0 = vmmov 0   ;;  %s530_s0 = inlined_call_operand.vmem [shape: f32[8,128], index: 0, kind: input, shape index: {}]   ;;  %s531_s1 = inlined_call_operand.vmem [shape: f32[128,128], index: 1, kind: input, shape index: {}]   ;;  %s532_s2 = inlined_call_operand.vmem [shape: f32[1,128], index: 2, kind: input, shape index: {}]   ;;  %s533_s3 = inlined_call_operand.vmem [shape: f32[128,64], index: 3, kind: input, shape index: {}]   ;;  %s534_s4 = inlined_call_operand.vmem [shape: f32[1,64], index: 4, kind: input, shape index: {}]   ;;  %s535_s5 = inlined_call_operand.hbm [shape: f32[8,64], index: 5, kind: output, shape index: {}]  }
   0x1   :  { %v37_v0 = vld [vmem:[%s531_s1 + $0x78] sm:$0xff]  ;;  %260 = vmatprep.subr.mxu0 %v355_v1  ;;  %v36_v2 = vld [vmem:[%s531_s1 + $0x70] sm:$0xff]  ;;  %292 = vmatprep.mubr.msk.f32.mxu0 %vm356_vm0, %v355_v1  ;;  %v35_v3 = vld [vmem:[%s531_s1 + $0x68] sm:$0xff] }
   0x2   :  { %261 = vmatpush3.msra.mxu0 %v37_v0  ;;  %295 = vmatprep.subr.mxu1 %v355_v1  ;;  %v34_v4 = vld [vmem:[%s531_s1 + $0x60] sm:$0xff]  ;;  %v130_v5 = vld [vmem:[%s533_s3 + $0x78] sm:$0xff]  ;;  %v129_v6 = vld [vmem:[%s533_s3 + $0x70] sm:$0xff] }
   0x3   :  { %262 = vmatprep.subr.mxu0 %v355_v1  ;;  %327 = vmatprep.mubr.msk.f32.mxu1 %vm356_vm0, %v355_v1  ;;  %v33_v7 = vld [vmem:[%s531_s1 + $0x58] sm:$0xff]  ;;  %v128_v8 = vld [vmem:[%s533_s3 + $0x68] sm:$0xff]  ;;  %v32_v9 = vld [vmem:[%s531_s1 + $0x50] sm:$0xff] }
   0x4   :  { %263 = vmatpush3.msra.mxu0 %v36_v2  ;;  %296 = vmatpush3.msra.mxu1 %v130_v5  ;;  %v127_v10 = vld [vmem:[%s533_s3 + $0x60] sm:$0xff] }
   0x5   :  { %264 = vmatprep.subr.mxu0 %v355_v1  ;;  %297 = vmatprep.subr.mxu1 %v355_v1 }
   0x6   :  { %265 = vmatpush3.msra.mxu0 %v35_v3  ;;  %298 = vmatpush3.msra.mxu1 %v129_v6 }
   0x7   :  { %266 = vmatprep.subr.mxu0 %v355_v1  ;;  %299 = vmatprep.subr.mxu1 %v355_v1 }
   0x8   :  { %267 = vmatpush3.msra.mxu0 %v34_v4  ;;  %300 = vmatpush3.msra.mxu1 %v128_v8 }
   0x9   :  { %268 = vmatprep.subr.mxu0 %v355_v1 }
   0xa   :  { %269 = vmatpush3.msra.mxu0 %v33_v7 }
   0xb   :  { %10 = vsyncpa [#allocation3], 0  ;;  %270 = vmatprep.subr.mxu0 %v355_v1  ;;  %v31_v11 = vld [vmem:[%s531_s1 + $0x48] sm:$0xff]  ;;  %301 = vmatprep.subr.mxu1 %v355_v1  ;;  %v126_v12 = vld [vmem:[%s533_s3 + $0x58] sm:$0xff]  ;;  %s357_s11 = smov [#allocation2]   ;;  %vm208_vm1 = vcmask 523264  }
   0xc   :  { %271 = vmatpush3.msra.mxu0 %v32_v9  ;;  %302 = vmatpush3.msra.mxu1 %v127_v10  ;;  %v30_v13 = vld [vmem:[%s531_s1 + $0x40] sm:$0xff]  ;;  %v125_v14 = vld [vmem:[%s533_s3 + $0x50] sm:$0xff]  ;;  %v29_v15 = vld [vmem:[%s531_s1 + $0x38] sm:$0xff]  ;;  %s216_s12 = sshll.u32 %s357_s11, 4  ;;  %s217_s12 = int_to_ptr.vmem [resolvable:$true] %s216_s12 }
   0xd   :  { %272 = vmatprep.subr.mxu0 %v355_v1  ;;  %303 = vmatprep.subr.mxu1 %v355_v1  ;;  %v124_v16 = vld [vmem:[%s533_s3 + $0x48] sm:$0xff]  ;;  %v28_v17 = vld [vmem:[%s531_s1 + $0x30] sm:$0xff]  ;;  %v123_v18 = vld [vmem:[%s533_s3 + $0x40] sm:$0xff]  ;;  %p338_p1 = scmp.lt.s32.totalorder %s217_s12, %s217_s12 }
   0xe   :  { %273 = vmatpush3.msra.mxu0 %v31_v11  ;;  %304 = vmatpush3.msra.mxu1 %v126_v12  ;;  %v27_v19 = vld [vmem:[%s531_s1 + $0x28] sm:$0xff]  ;;  %v122_v20 = vld [vmem:[%s533_s3 + $0x38] sm:$0xff]  ;;  %v26_v21 = vld [vmem:[%s531_s1 + $0x20] sm:$0xff] }
   0xf   :  { %274 = vmatprep.subr.mxu0 %v355_v1  ;;  %305 = vmatprep.subr.mxu1 %v355_v1  ;;  %v121_v22 = vld [vmem:[%s533_s3 + $0x30] sm:$0xff]  ;;  %v25_v23 = vld [vmem:[%s531_s1 + $0x18] sm:$0xff]  ;;  %v120_v24 = vld [vmem:[%s533_s3 + $0x28] sm:$0xff] }
  0x10   :  { %275 = vmatpush3.msra.mxu0 %v30_v13  ;;  %306 = vmatpush3.msra.mxu1 %v125_v14  ;;  %v24_v25 = vld [vmem:[%s531_s1 + $0x10] sm:$0xff]  ;;  %v119_v26 = vld [vmem:[%s533_s3 + $0x20] sm:$0xff]  ;;  %v23_v27 = vld [vmem:[%s531_s1 + $0x8] sm:$0xff] }
  0x11   :  { %276 = vmatprep.subr.mxu0 %v355_v1  ;;  %307 = vmatprep.subr.mxu1 %v355_v1  ;;  %v118_v28 = vld [vmem:[%s533_s3 + $0x18] sm:$0xff]  ;;  %v22_v29 = vld [vmem:[%s531_s1] sm:$0xff]  ;;  %v117_v30 = vld [vmem:[%s533_s3 + $0x10] sm:$0xff] }
  0x12   :  { %277 = vmatpush3.msra.mxu0 %v29_v15  ;;  %308 = vmatpush3.msra.mxu1 %v124_v16  ;;  %v21_v31 = vld [vmem:[%s530_s0] sm:$0xff]  ;;  %v116_v32 = vld [vmem:[%s533_s3 + $0x8] sm:$0xff] }
  0x13   :  { %278 = vmatprep.subr.mxu0 %v355_v1  ;;  %309 = vmatprep.subr.mxu1 %v355_v1  ;;  %v115_v33 = vld [vmem:[%s533_s3] sm:$0xff]  ;;  %s333_s3 = scalar_lea.vmem %s217_s12, 128 }
  0x14   :  { %279 = vmatpush3.msra.mxu0 %v28_v17  ;;  %310 = vmatpush3.msra.mxu1 %v123_v18  ;;  %v224_v34 = vld [vmem:[%s532_s2] ss:$0 sm:$0xff]  ;;  %p334_p0 = scmp.ne.s32.totalorder %s217_s12, %s333_s3  ;;  %p339_p2 = scmp.lt.s32.totalorder %s333_s3, %s333_s3 }
  0x15   :  { %280 = vmatprep.subr.mxu0 %v355_v1  ;;  %311 = vmatprep.subr.mxu1 %v355_v1  ;;  %v225_v38 = vld [vmem:[%s534_s4] ss:$0 sm:$0xff] }
  0x16   :  { %281 = vmatpush3.msra.mxu0 %v27_v19  ;;  %312 = vmatpush3.msra.mxu1 %v122_v20  ;;  %p340_p3 = por %p339_p2, %p338_p1 }
  0x17   :  { %282 = vmatprep.subr.mxu0 %v355_v1  ;;  %313 = vmatprep.subr.mxu1 %v355_v1 }
  0x18   :  { %283 = vmatpush3.msra.mxu0 %v26_v21  ;;  %314 = vmatpush3.msra.mxu1 %v121_v22  ;;  %p341_p4 = pnand %p340_p3, %p334_p0 }
  0x19   :  { %284 = vmatprep.subr.mxu0 %v355_v1  ;;  %315 = vmatprep.subr.mxu1 %v355_v1 }
  0x1a   :  { %285 = vmatpush3.msra.mxu0 %v25_v23  ;;  %316 = vmatpush3.msra.mxu1 %v120_v24 }
  0x1b   :  { %286 = vmatprep.subr.mxu0 %v355_v1  ;;  %317 = vmatprep.subr.mxu1 %v355_v1 }
  0x1c   :  { %287 = vmatpush3.msra.mxu0 %v24_v25  ;;  %318 = vmatpush3.msra.mxu1 %v119_v26 }
  0x1d   :  { %288 = vmatprep.subr.mxu0 %v355_v1  ;;  %319 = vmatprep.subr.mxu1 %v355_v1 }
  0x1e   :  { %289 = vmatpush3.msra.mxu0 %v23_v27  ;;  %320 = vmatpush3.msra.mxu1 %v118_v28 }
  0x1f   :  { %290 = vmatprep.subr.mxu0 %v355_v1  ;;  %321 = vmatprep.subr.mxu1 %v355_v1 }
  0x20   :  { %291 = vmatpush3.msra.mxu0 %v22_v29  ;;  %322 = vmatpush3.msra.mxu1 %v117_v30 }
  0x21   :  { %293 = vmatmul.mubr.f32.vlgmr.msra.gmra.mxu0 %v21_v31  ;;  %323 = vmatprep.subr.mxu1 %v355_v1 }
  0x22   :  { %324 = vmatpush3.msra.mxu1 %v116_v32 }
  0x23   :  { %325 = vmatprep.subr.mxu1 %v355_v1 }
  0x24   :  { %326 = vmatpush3.msra.mxu1 %v115_v33 }
  0xe1   :  { %v111_v35 = vpop.f32.mrf.mxu0 }
  0xe2   :  { %v112_v36 = vadd.f32 %v224_v34, %v111_v35 }
  0xe3   :  { %v294_v37 = vpop.f32.mrf.mxu0 }
  0xe4   :  { %328 = vmatmul.mubr.f32.vlgmr.msra.gmra.mxu1 %v112_v36 }
 0x1a4   :  { %v204_v39 = vpop.f32.mrf.mxu1 }
 0x1a5   :  { %v205_v40 = vadd.f32 %v225_v38, %v204_v39 }
 0x1a6   :  { %v329_v41 = vpop.f32.mrf.mxu1 }
 0x1a7   :  { %209 = vst.msk [vmem:[#allocation2] sm:$0xff] %vm208_vm1, %v205_v40 }
 0x1a8   :  { %344 = shalt.err (!%p341_p4)
}
 0x1a9   :  { %219 = dma.vmem_to_hbm [thread:$0]  %s217_s12, 128, %s535_s5, [#allocation3]  }
 0x1aa   :  { %353 = dma.done.wait [#allocation3], 128  }
 0x1ab   :  { %354 = vsyncadd [#allocation3], 4294967168 }
 0x1ac   :  { %223 = vsyncpa [#allocation3], 1 }

</bundles_post_ra>
